<compile_context>
chip_gen: v6e
topology: v6e:2x2x1
jax: 0.10.0
libtpu: 0.0.40
codegen_flags: <defaults>
</compile_context>

<pallas_src>
import numpy as np
import jax
import jax.numpy as jnp
from jax.experimental import pallas as pl
from jax.experimental.pallas import tpu as pltpu


def _round_up(n, m):
    return ((n + m - 1) // m) * m


def _generator_kernel(x_ref, w1_ref, b1_ref, w2_ref, b2_ref, out_ref):
    """One batch tile: sigmoid(relu(x @ W1 + b1) @ W2 + b2).

    Matmul inputs are bf16 (MXU native); accumulation, bias adds, ReLU and the
    sigmoid epilogue run in f32.
    """
    x = x_ref[...]                                                     # (TM, K) bf16
    h = jnp.dot(x, w1_ref[...], preferred_element_type=jnp.float32)   # f32 acc
    h = jnp.maximum(h + b1_ref[...], 0.0)                             # bias + ReLU (f32, VPU)
    g = jnp.dot(h.astype(jnp.bfloat16), w2_ref[...],
                preferred_element_type=jnp.float32) + b2_ref[...]
    # sigmoid(g) = 1 / (1 + exp(-g)); exp and approx reciprocal both use the EUP slot.
    out_ref[...] = pl.reciprocal(1.0 + jnp.exp(-g), approx=True)


def generator_forward(x, w1, b1, w2, b2, image_shape, *, batch_tile=256):
    """x: (B, in_dim) float32. Weights stored as (in_features, out_features)
    (i.e. PyTorch weight.T), biases as (1, out_features).
    Returns (B,) + image_shape float32."""
    batch, in_dim = x.shape
    hidden = w1.shape[1]
    out_dim = w2.shape[1]
    assert w1.shape[0] == in_dim and w2.shape[0] == hidden
    assert out_dim == int(np.prod(image_shape))

    # ---- pad hidden & output feature dims to lane-dense multiples of 128 ----
    hid_p = _round_up(hidden, 128)
    out_p = _round_up(out_dim, 128)
    if hid_p != hidden:
        w1 = jnp.pad(w1, ((0, 0), (0, hid_p - hidden)))
        b1 = jnp.pad(b1, ((0, 0), (0, hid_p - hidden)))
        w2 = jnp.pad(w2, ((0, hid_p - hidden), (0, 0)))
    if out_p != out_dim:
        w2 = jnp.pad(w2, ((0, 0), (0, out_p - out_dim)))
        b2 = jnp.pad(b2, ((0, 0), (0, out_p - out_dim)))

    # ---- batch: pad to a sublane-friendly (bf16) tile, then tile on the grid ----
    tm = min(batch_tile, _round_up(batch, 16))
    batch_p = _round_up(batch, tm)
    if batch_p != batch:
        x = jnp.pad(x, ((0, batch_p - batch), (0, 0)))

    # ---- bf16 matmul inputs; biases & accumulation stay f32 ----
    x_bf = x.astype(jnp.bfloat16)
    w1_bf = w1.astype(jnp.bfloat16)
    w2_bf = w2.astype(jnp.bfloat16)
    b1_f32 = b1.astype(jnp.float32)
    b2_f32 = b2.astype(jnp.float32)

    flat = pl.pallas_call(
        _generator_kernel,
        out_shape=jax.ShapeDtypeStruct((batch_p, out_p), jnp.float32),
        grid=(batch_p // tm,),
        in_specs=[
            pl.BlockSpec((tm, in_dim), lambda i: (i, 0)),      # x: tiled on batch
            pl.BlockSpec((in_dim, hid_p), lambda i: (0, 0)),   # W1: resident across tiles
            pl.BlockSpec((1, hid_p), lambda i: (0, 0)),        # b1: resident
            pl.BlockSpec((hid_p, out_p), lambda i: (0, 0)),    # W2: resident
            pl.BlockSpec((1, out_p), lambda i: (0, 0)),        # b2: resident
        ],
        out_specs=pl.BlockSpec((tm, out_p), lambda i: (i, 0)),
        compiler_params=pltpu.CompilerParams(
            dimension_semantics=("parallel",),   # shard batch tiles across TCs on v7x
        ),
    )(x_bf, w1_bf, b1_f32, w2_bf, b2_f32)

    # Drop batch / feature padding and reshape to NCHW image layout.
    return flat[:batch, :out_dim].reshape((batch,) + tuple(image_shape))


def init_generator_params(key, in_dim, hidden_dim, out_dim):
    """Deterministic init mimicking PyTorch nn.Linear default (uniform +-1/sqrt(fan_in)).

    Weights stored as (in_features, out_features) — i.e. PyTorch weight.T.
    Biases stored as (1, out_features) for 2D broadcast inside the kernel.
    """
    k1, k2, k3, k4 = jax.random.split(key, 4)
    s1 = 1.0 / np.sqrt(in_dim)
    s2 = 1.0 / np.sqrt(hidden_dim)
    w1 = jax.random.uniform(k1, (in_dim, hidden_dim), jnp.float32, -s1, s1)
    b1 = jax.random.uniform(k2, (1, hidden_dim), jnp.float32, -s1, s1)
    w2 = jax.random.uniform(k3, (hidden_dim, out_dim), jnp.float32, -s2, s2)
    b2 = jax.random.uniform(k4, (1, out_dim), jnp.float32, -s2, s2)
    return w1, b1, w2, b2


if __name__ == "__main__":
    # Small shapes consistent with the module:
    #   image_shape = (C, H, W) = (1, 16, 16)  -> np.prod = 256
    #   z_dim=32, disc_dim=10, cont_dim=2      -> in_dim = 44
    #   hidden_dim = 400 (fixed in __init__)
    image_shape = (1, 16, 16)
    z_dim, disc_dim, cont_dim = 32, 10, 2
    hidden_dim = 400
    batch = 2

    in_dim = z_dim + disc_dim + cont_dim
    out_dim = int(np.prod(image_shape))

    key = jax.random.PRNGKey(0)
    kx, kp = jax.random.split(key)
    x = jax.random.normal(kx, (batch, in_dim), dtype=jnp.float32)
    w1, b1, w2, b2 = init_generator_params(kp, in_dim, hidden_dim, out_dim)

    out = generator_forward(x, w1, b1, w2, b2, image_shape)
    out = jax.block_until_ready(out)

    # Sanity check against a pure-JAX f32 reference (same math). The kernel uses
    # bf16 matmul inputs + an approximate EUP reciprocal, so tolerances are loose.
    ref = jax.nn.sigmoid(
        jnp.maximum(x @ w1 + b1, 0.0) @ w2 + b2
    ).reshape((batch,) + image_shape)
    assert out.shape == (batch,) + image_shape
    np.testing.assert_allclose(np.asarray(out), np.asarray(ref), rtol=2e-2, atol=2e-2)

    print("KERNEL_OK")
</pallas_src>

<mosaic_0001>
module attributes {stable_mosaic.version = 11 : i64} {
  func.func @_generator_kernel(%arg0: i32, %arg1: memref<16x44xbf16, #tpu.memory_space<vmem>>, %arg2: memref<44x512xbf16, #tpu.memory_space<vmem>>, %arg3: memref<1x512xf32, #tpu.memory_space<vmem>>, %arg4: memref<512x256xbf16, #tpu.memory_space<vmem>>, %arg5: memref<1x256xf32, #tpu.memory_space<vmem>>, %arg6: memref<16x256xf32, #tpu.memory_space<vmem>>) attributes {dimension_semantics = [#tpu.dimension_semantics<parallel>], iteration_bounds = array<i64: 1>, scalar_prefetch = 0 : i64, scratch_operands = 0 : i64, tpu.core_type = #tpu.core_type<tc>, window_params = [{transform_indices = @transform_0, window_bounds = array<i64: 16, 44>}, {pipeline_mode = #tpu.pipeline_mode<synchronous>, transform_indices = @transform_1, window_bounds = array<i64: 44, 512>}, {pipeline_mode = #tpu.pipeline_mode<synchronous>, transform_indices = @transform_2, window_bounds = array<i64: 1, 512>}, {pipeline_mode = #tpu.pipeline_mode<synchronous>, transform_indices = @transform_3, window_bounds = array<i64: 512, 256>}, {pipeline_mode = #tpu.pipeline_mode<synchronous>, transform_indices = @transform_4, window_bounds = array<i64: 1, 256>}, {transform_indices = @transform_5, window_bounds = array<i64: 16, 256>}]} {
    %c0 = arith.constant 0 : index
    %c0_0 = arith.constant 0 : index
    %0 = vector.load %arg1[%c0, %c0_0] : memref<16x44xbf16, #tpu.memory_space<vmem>>, vector<16x44xbf16>
    %c0_1 = arith.constant 0 : index
    %c0_2 = arith.constant 0 : index
    %1 = vector.load %arg2[%c0_1, %c0_2] : memref<44x512xbf16, #tpu.memory_space<vmem>>, vector<44x512xbf16>
    %cst = arith.constant dense<0.000000e+00> : vector<16x512xf32>
    %2 = tpu.matmul %0, %1, %cst {dimension_numbers = #tpu.dot_dimension_numbers<[1], [0], [0], [1], [0, 0, 1, 1], [], []>} : vector<16x44xbf16>, vector<44x512xbf16>, vector<16x512xf32> -> vector<16x512xf32>
    %c0_3 = arith.constant 0 : index
    %c0_4 = arith.constant 0 : index
    %3 = vector.load %arg3[%c0_3, %c0_4] : memref<1x512xf32, #tpu.memory_space<vmem>>, vector<1x512xf32>
    %4 = vector.broadcast %3 : vector<1x512xf32> to vector<16x512xf32>
    %5 = arith.addf %2, %4 : vector<16x512xf32>
    %cst_5 = arith.constant 0.000000e+00 : f32
    %6 = vector.broadcast %cst_5 : f32 to vector<16x512xf32>
    %7 = arith.maximumf %5, %6 : vector<16x512xf32>
    %8 = arith.truncf %7 : vector<16x512xf32> to vector<16x512xbf16>
    %c0_6 = arith.constant 0 : index
    %c0_7 = arith.constant 0 : index
    %9 = vector.load %arg4[%c0_6, %c0_7] : memref<512x256xbf16, #tpu.memory_space<vmem>>, vector<512x256xbf16>
    %cst_8 = arith.constant dense<0.000000e+00> : vector<16x256xf32>
    %10 = tpu.matmul %8, %9, %cst_8 {dimension_numbers = #tpu.dot_dimension_numbers<[1], [0], [0], [1], [0, 0, 1, 1], [], []>} : vector<16x512xbf16>, vector<512x256xbf16>, vector<16x256xf32> -> vector<16x256xf32>
    %c0_9 = arith.constant 0 : index
    %c0_10 = arith.constant 0 : index
    %11 = vector.load %arg5[%c0_9, %c0_10] : memref<1x256xf32, #tpu.memory_space<vmem>>, vector<1x256xf32>
    %12 = vector.broadcast %11 : vector<1x256xf32> to vector<16x256xf32>
    %13 = arith.addf %10, %12 : vector<16x256xf32>
    %cst_11 = arith.constant 0.000000e+00 : f32
    %14 = vector.broadcast %cst_11 : f32 to vector<16x256xf32>
    %15 = arith.subf %14, %13 : vector<16x256xf32>
    %16 = math.exp %15 : vector<16x256xf32>
    %cst_12 = arith.constant 1.000000e+00 : f32
    %17 = vector.broadcast %cst_12 : f32 to vector<16x256xf32>
    %18 = arith.addf %17, %16 : vector<16x256xf32>
    %19 = tpu.reciprocal %18 {approx = true} : vector<16x256xf32> -> vector<16x256xf32>
    %c0_13 = arith.constant 0 : index
    %c0_14 = arith.constant 0 : index
    %20 = vector.load %arg6[%c0_13, %c0_14] : memref<16x256xf32, #tpu.memory_space<vmem>>, vector<16x256xf32>
    tpu.vector_store %arg6[%c0_13, %c0_14], %19 {strides = array<i32>} : memref<16x256xf32, #tpu.memory_space<vmem>>, vector<16x256xf32>,
    return
  }
  func.func @transform_0(%arg0: i32) -> (i32, i32) {
    %c0_i32 = arith.constant 0 : i32
    %c0_i32_0 = arith.constant 0 : i32
    return %arg0, %c0_i32 : i32, i32
  }
  func.func @transform_1(%arg0: i32) -> (i32, i32) {
    %c0_i32 = arith.constant 0 : i32
    %c0_i32_0 = arith.constant 0 : i32
    %c0_i32_1 = arith.constant 0 : i32
    return %c0_i32, %c0_i32_0 : i32, i32
  }
  func.func @transform_2(%arg0: i32) -> (i32, i32) {
    %c0_i32 = arith.constant 0 : i32
    %c0_i32_0 = arith.constant 0 : i32
    %c0_i32_1 = arith.constant 0 : i32
    return %c0_i32, %c0_i32_0 : i32, i32
  }
  func.func @transform_3(%arg0: i32) -> (i32, i32) {
    %c0_i32 = arith.constant 0 : i32
    %c0_i32_0 = arith.constant 0 : i32
    %c0_i32_1 = arith.constant 0 : i32
    return %c0_i32, %c0_i32_0 : i32, i32
  }
  func.func @transform_4(%arg0: i32) -> (i32, i32) {
    %c0_i32 = arith.constant 0 : i32
    %c0_i32_0 = arith.constant 0 : i32
    %c0_i32_1 = arith.constant 0 : i32
    return %c0_i32, %c0_i32_0 : i32, i32
  }
  func.func @transform_5(%arg0: i32) -> (i32, i32) {
    %c0_i32 = arith.constant 0 : i32
    %c0_i32_0 = arith.constant 0 : i32
    return %arg0, %c0_i32 : i32, i32
  }
}

</mosaic_0001>

<bundles_post_ra>
// kernel: tpu_custom_call.1
= control target key start
LH: loop header
LB: loop body
LE: loop exit
PB: predicated region body
PF: predicated region fallthrough
CT: control target
= control target key end

     0   :  { %10 = vsyncpa [#allocation3], 0  ;;  %s1210_s0 = inlined_call_operand.hbm [shape: bf16[16,44], index: 0, kind: input, shape index: {}]   ;;  %s1211_s1 = inlined_call_operand.hbm [shape: bf16[44,512], index: 1, kind: input, shape index: {}]   ;;  %s1212_s2 = inlined_call_operand.hbm [shape: f32[1,512], index: 2, kind: input, shape index: {}]   ;;  %s1213_s3 = inlined_call_operand.hbm [shape: bf16[512,256], index: 3, kind: input, shape index: {}]   ;;  %s1214_s4 = inlined_call_operand.vmem [shape: f32[1,256], index: 4, kind: input, shape index: {}]   ;;  %s1215_s5 = inlined_call_operand.hbm [shape: f32[16,256], index: 5, kind: output, shape index: {}]  }
   0x1   :  { %11 = vsyncpa [#allocation6], 0 }
   0x2   :  { %12 = vsyncpa [#allocation9], 0 }
   0x3   :  { %13 = vsyncpa [#allocation4], 0  ;;  %s1144_s18 = smov [#allocation5]  }
   0x4   :  { %s31_s19 = sshll.u32 %s1144_s18, 4  ;;  %s32_s19 = int_to_ptr.vmem [resolvable:$true] %s31_s19 }
   0x5   :  { %s1044_s20 = scalar_lea.vmem %s32_s19, 1536  ;;  %p1049_p1 = scmp.lt.s32.totalorder %s32_s19, %s32_s19 }
   0x6   :  { %p1045_p0 = scmp.ne.s32.totalorder %s32_s19, %s1044_s20  ;;  %p1050_p2 = scmp.lt.s32.totalorder %s1044_s20, %s1044_s20 }
   0x8   :  { %p1051_p3 = por %p1050_p2, %p1049_p1 }
   0xa   :  { %p1052_p4 = pnand %p1051_p3, %p1045_p0 }
   0xc   :  { %1055 = shalt.err (!%p1052_p4)
}
   0xd   :  { %s1145_s21 = smov 256   ;;  %s1146_s22 = smov 16  }
   0xe   :  { %37 = dma.hbm_to_vmem [thread:$0]  %s1211_s1, 1536, %s32_s19, [#allocation6], %s1145_s21, %s1145_s21, %s1146_s22  }
   0xf   :  { %s1147_s25 = smov [#allocation2]  }
  0x10   :  { %s19_s26 = sshll.u32 %s1147_s25, 4  ;;  %s20_s26 = int_to_ptr.vmem [resolvable:$true] %s19_s26 }
  0x11   :  { %s1064_s27 = scalar_lea.vmem %s20_s26, 128  ;;  %p1069_p6 = scmp.lt.s32.totalorder %s20_s26, %s20_s26 }
  0x12   :  { %p1065_p5 = scmp.ne.s32.totalorder %s20_s26, %s1064_s27  ;;  %p1070_p7 = scmp.lt.s32.totalorder %s1064_s27, %s1064_s27 }
  0x14   :  { %p1071_p8 = por %p1070_p7, %p1069_p6 }
  0x16   :  { %p1072_p9 = pnand %p1071_p8, %p1065_p5 }
  0x18   :  { %1075 = shalt.err (!%p1072_p9)
}
  0x19   :  { %s1148_s28 = smov 64   ;;  %s1149_s29 = smov 4  }
  0x1a   :  { %25 = dma.hbm_to_vmem [thread:$0]  %s1210_s0, 128, %s20_s26, [#allocation3], %s1148_s28, %s1148_s28, %s1149_s29  }
  0x1b   :  { %s1150_s7 = smov [#allocation7]   ;;  %s1151_s9 = smov [#allocation8]  }
  0x1c   :  { %s44_s8 = sshll.u32 %s1150_s7, 4  ;;  %s53_s1 = sshll.u32 %s1151_s9, 4  ;;  %s45_s8 = int_to_ptr.vmem [resolvable:$true] %s44_s8  ;;  %s54_s1 = int_to_ptr.vmem [resolvable:$true] %s53_s1 }
  0x1d   :  { %s1084_s10 = scalar_lea.vmem %s45_s8, 64  ;;  %p1089_p11 = scmp.lt.s32.totalorder %s45_s8, %s45_s8 }
  0x1e   :  { %p1085_p10 = scmp.ne.s32.totalorder %s45_s8, %s1084_s10  ;;  %p1090_p12 = scmp.lt.s32.totalorder %s1084_s10, %s1084_s10 }
  0x20   :  { %p1091_p13 = por %p1090_p12, %p1089_p11 }
  0x22   :  { %p1092_p0 = pnand %p1091_p13, %p1085_p10 }
  0x24   :  { %1095 = shalt.err (!%p1092_p0)
}
  0x25   :  { %47 = dma.hbm_to_vmem [thread:$0]  %s1212_s2, 64, %s45_s8, [#allocation6]  }
  0x26   :  { %s1104_s13 = scalar_lea.vmem %s54_s1, 8192  ;;  %p1109_p2 = scmp.lt.s32.totalorder %s54_s1, %s54_s1 }
  0x27   :  { %p1105_p1 = scmp.ne.s32.totalorder %s54_s1, %s1104_s13  ;;  %p1110_p3 = scmp.lt.s32.totalorder %s1104_s13, %s1104_s13 }
  0x29   :  { %p1111_p4 = por %p1110_p3, %p1109_p2 }
  0x2b   :  { %p1112_p5 = pnand %p1111_p4, %p1105_p1 }
  0x2d   :  { %1115 = shalt.err (!%p1112_p5)
}
  0x2e   :  { %s1152_s0 = smov 128   ;;  %s1153_s14 = smov 8  }
  0x2f   :  { %59 = dma.hbm_to_vmem [thread:$0]  %s1213_s3, 8192, %s54_s1, [#allocation9], %s1152_s0, %s1152_s0, %s1153_s14  }
  0x30   :  { %1136 = dma.done.wait [#allocation3], 128  }
  0x31   :  { %1137 = vsyncadd [#allocation3], 4294967168 }
  0x32   :  { %1138 = dma.done.wait [#allocation6], 1600  }
  0x33   :  { %1139 = vsyncadd [#allocation6], 4294965696 }
  0x34   :  { %1140 = dma.done.wait [#allocation9], 8192  }
  0x35   :  { %1141 = vsyncadd [#allocation9], 4294959104  ;;  %v1154_v0 = vmov 0   ;;  %vm176_vm0 = vcmask 1045504   ;;  %v911_v5 = vld [vmem:[#allocation5 + $0x24] ss:$16 sps:$4 sm:$0xff]  }
  0x36   :  { %221 = vmatprep.mubr.bf16.mxu0 %v1154_v0  ;;  %264 = vmatprep.mubr.bf16.mxu1 %v1154_v0  ;;  %v905_v1 = vld [vmem:[#allocation5 + $0x44] ss:$16 sps:$4 sm:$0x3f]   ;;  %v907_v2 = vld [vmem:[#allocation5 + $0x4c] ss:$16 sps:$4 sm:$0x3f]  }
  0x37   :  { %825 = vmatprep.subr.msk.bf16.mxu0 %vm176_vm0, %v905_v1  ;;  %v909_v3 = vld [vmem:[#allocation5 + $0x40] ss:$16 sps:$4 sm:$0x3f]   ;;  %v910_v4 = vld [vmem:[#allocation5 + $0x48] ss:$16 sps:$4 sm:$0x3f]   ;;  %827 = vmatprep.subr.msk.bf16.mxu1 %vm176_vm0, %v907_v2 }
  0x38   :  { %v178_v6 = vsel %vm176_vm0, %v909_v3, 0  ;;  %v184_v7 = vsel %vm176_vm0, %v910_v4, 0  ;;  %v913_v8 = vld [vmem:[#allocation5 + $0x2c] ss:$16 sps:$4 sm:$0xff]   ;;  %v915_v9 = vld [vmem:[#allocation5 + $0x20] ss:$16 sps:$4 sm:$0xff]  }
  0x39   :  { %200 = vmatpush1.bf16.msra.mxu0 %v178_v6  ;;  %243 = vmatpush1.bf16.msra.mxu1 %v184_v7  ;;  %v916_v10 = vld [vmem:[#allocation5 + $0x28] ss:$16 sps:$4 sm:$0xff]   ;;  %v917_v11 = vld [vmem:[#allocation5 + $0x4] ss:$16 sps:$4 sm:$0xff]   ;;  %v919_v12 = vld [vmem:[#allocation5 + $0xc] ss:$16 sps:$4 sm:$0xff]  }
  0x3a   :  { %201 = vmatprep.subr.bf16.mxu0 %v911_v5  ;;  %244 = vmatprep.subr.bf16.mxu1 %v913_v8  ;;  %v921_v13 = vld [vmem:[#allocation5] ss:$16 sps:$4 sm:$0xff]   ;;  %v922_v14 = vld [vmem:[#allocation5 + $0x8] ss:$16 sps:$4 sm:$0xff]   ;;  %v924_v18 = vld [vmem:[#allocation8 + $0x70] ss:$8 sps:$4 sm:$0xff]  }
  0x3b   :  { %v926_v15 = vld [vmem:[#allocation8 + $0x74] ss:$8 sps:$4 sm:$0xff]   ;;  %vm172_vm1 = vcmask 359424   ;;  %v927_v19 = vld [vmem:[#allocation8 + $0x170] ss:$8 sps:$4 sm:$0xff]  }
  0x3c   :  { %v923_v16 = vld [vmem:[#allocation2] sm:$0xff]   ;;  %v932_v20 = vld [vmem:[#allocation8 + $0x64] ss:$8 sps:$4 sm:$0xff]   ;;  %v930_v22 = vld [vmem:[#allocation8 + $0x60] ss:$8 sps:$4 sm:$0xff]  }
  0x3d   :  { %202 = vmatpush1.bf16.msra.mxu0 %v915_v9  ;;  %245 = vmatpush1.bf16.msra.mxu1 %v916_v10  ;;  %v929_v17 = vld [vmem:[#allocation8 + $0x174] ss:$8 sps:$4 sm:$0xff]   ;;  %v935_v21 = vld [vmem:[#allocation8 + $0x164] ss:$8 sps:$4 sm:$0xff]   ;;  %v933_v23 = vld [vmem:[#allocation8 + $0x160] ss:$8 sps:$4 sm:$0xff]  }
  0x3e   :  { %203 = vmatprep.subr.bf16.mxu0 %v917_v11  ;;  %246 = vmatprep.subr.bf16.mxu1 %v919_v12  ;;  %v938_v24 = vld [vmem:[#allocation8 + $0x54] ss:$8 sps:$4 sm:$0xff]   ;;  %v936_v26 = vld [vmem:[#allocation8 + $0x50] ss:$8 sps:$4 sm:$0xff]   ;;  %v944_v28 = vld [vmem:[#allocation8 + $0x44] ss:$8 sps:$4 sm:$0xff]  }
  0x3f   :  { %v941_v25 = vld [vmem:[#allocation8 + $0x154] ss:$8 sps:$4 sm:$0xff]   ;;  %v939_v27 = vld [vmem:[#allocation8 + $0x150] ss:$8 sps:$4 sm:$0xff]   ;;  %v947_v29 = vld [vmem:[#allocation8 + $0x144] ss:$8 sps:$4 sm:$0xff]  }
  0x40   :  { %v942_v30 = vld [vmem:[#allocation8 + $0x40] ss:$8 sps:$4 sm:$0xff]   ;;  %v950_v32 = vld [vmem:[#allocation8 + $0x34] ss:$8 sps:$4 sm:$0xff]   ;;  %v948_v34 = vld [vmem:[#allocation8 + $0x30] ss:$8 sps:$4 sm:$0xff]  }
  0x41   :  { %204 = vmatpush1.bf16.msra.mxu0 %v921_v13  ;;  %247 = vmatpush1.bf16.msra.mxu1 %v922_v14  ;;  %v945_v31 = vld [vmem:[#allocation8 + $0x140] ss:$8 sps:$4 sm:$0xff]   ;;  %v953_v33 = vld [vmem:[#allocation8 + $0x134] ss:$8 sps:$4 sm:$0xff]   ;;  %v951_v35 = vld [vmem:[#allocation8 + $0x130] ss:$8 sps:$4 sm:$0xff]  }
  0x42   :  { %683 = vmatprep.subr.bf16.mxu0 %v926_v15  ;;  %726 = vmatprep.subr.bf16.mxu1 %v929_v17  ;;  %v956_v36 = vld [vmem:[#allocation8 + $0x24] ss:$8 sps:$4 sm:$0xff]   ;;  %v954_v38 = vld [vmem:[#allocation8 + $0x20] ss:$8 sps:$4 sm:$0xff]   ;;  %v962_v40 = vld [vmem:[#allocation8 + $0x14] ss:$8 sps:$4 sm:$0xff]  }
  0x43   :  { %v959_v37 = vld [vmem:[#allocation8 + $0x124] ss:$8 sps:$4 sm:$0xff]   ;;  %v957_v39 = vld [vmem:[#allocation8 + $0x120] ss:$8 sps:$4 sm:$0xff]   ;;  %v965_v41 = vld [vmem:[#allocation8 + $0x114] ss:$8 sps:$4 sm:$0xff]  }
  0x44   :  { %826 = vmatmul.mubr.msk.bf16.vlgmr.msra.gmra.mxu0 %vm172_vm1, %v923_v16  ;;  %828 = vmatmul.mubr.msk.bf16.vlgmr.msra.gmra.mxu1 %vm172_vm1, %v923_v16  ;;  %v960_v42 = vld [vmem:[#allocation8 + $0x10] ss:$8 sps:$4 sm:$0xff]   ;;  %v968_v44 = vld [vmem:[#allocation8 + $0x4] ss:$8 sps:$4 sm:$0xff]   ;;  %v966_v46 = vld [vmem:[#allocation8] ss:$8 sps:$4 sm:$0xff]   ;;  %v91_v16 = vlaneseq }
  0x45   :  { %684 = vmatpush1.bf16.msra.mxu0 %v924_v18  ;;  %727 = vmatpush1.bf16.msra.mxu1 %v927_v19  ;;  %v963_v43 = vld [vmem:[#allocation8 + $0x110] ss:$8 sps:$4 sm:$0xff]   ;;  %v971_v45 = vld [vmem:[#allocation8 + $0x104] ss:$8 sps:$4 sm:$0xff]   ;;  %v969_v47 = vld [vmem:[#allocation8 + $0x100] ss:$8 sps:$4 sm:$0xff]  }
  0x46   :  { %685 = vmatprep.subr.bf16.mxu0 %v932_v20  ;;  %728 = vmatprep.subr.bf16.mxu1 %v935_v21  ;;  %v974_v48 = vld [vmem:[#allocation8 + $0xf4] ss:$8 sps:$4 sm:$0xff]   ;;  %v972_v50 = vld [vmem:[#allocation8 + $0xf0] ss:$8 sps:$4 sm:$0xff]   ;;  %v980_v52 = vld [vmem:[#allocation8 + $0xe4] ss:$8 sps:$4 sm:$0xff]  }
  0x47   :  { %v977_v49 = vld [vmem:[#allocation8 + $0x1f4] ss:$8 sps:$4 sm:$0xff]   ;;  %v975_v51 = vld [vmem:[#allocation8 + $0x1f0] ss:$8 sps:$4 sm:$0xff]   ;;  %v983_v53 = vld [vmem:[#allocation8 + $0x1e4] ss:$8 sps:$4 sm:$0xff]  }
  0x48   :  { %v978_v54 = vld [vmem:[#allocation8 + $0xe0] ss:$8 sps:$4 sm:$0xff]   ;;  %v986_v56 = vld [vmem:[#allocation8 + $0xd4] ss:$8 sps:$4 sm:$0xff]   ;;  %v984_v58 = vld [vmem:[#allocation8 + $0xd0] ss:$8 sps:$4 sm:$0xff]  }
  0x49   :  { %686 = vmatpush1.bf16.msra.mxu0 %v930_v22  ;;  %729 = vmatpush1.bf16.msra.mxu1 %v933_v23  ;;  %v981_v55 = vld [vmem:[#allocation8 + $0x1e0] ss:$8 sps:$4 sm:$0xff]   ;;  %v989_v57 = vld [vmem:[#allocation8 + $0x1d4] ss:$8 sps:$4 sm:$0xff]   ;;  %v987_v59 = vld [vmem:[#allocation8 + $0x1d0] ss:$8 sps:$4 sm:$0xff]  }
  0x4a   :  { %687 = vmatprep.subr.bf16.mxu0 %v938_v24  ;;  %730 = vmatprep.subr.bf16.mxu1 %v941_v25  ;;  %v992_v60 = vld [vmem:[#allocation8 + $0xc4] ss:$8 sps:$4 sm:$0xff]   ;;  %v990_v62 = vld [vmem:[#allocation8 + $0xc0] ss:$8 sps:$4 sm:$0xff]   ;;  %v998_v0 = vld [vmem:[#allocation8 + $0xb4] ss:$8 sps:$4 sm:$0xff]  }
  0x4b   :  { %v995_v61 = vld [vmem:[#allocation8 + $0x1c4] ss:$8 sps:$4 sm:$0xff]   ;;  %v993_v63 = vld [vmem:[#allocation8 + $0x1c0] ss:$8 sps:$4 sm:$0xff]   ;;  %v1001_v1 = vld [vmem:[#allocation8 + $0x1b4] ss:$8 sps:$4 sm:$0xff]  }
  0x4c   :  { %v996_v2 = vld [vmem:[#allocation8 + $0xb0] ss:$8 sps:$4 sm:$0xff]   ;;  %v1004_v4 = vld [vmem:[#allocation8 + $0xa4] ss:$8 sps:$4 sm:$0xff]   ;;  %v1002_v6 = vld [vmem:[#allocation8 + $0xa0] ss:$8 sps:$4 sm:$0xff]  }
  0x4d   :  { %688 = vmatpush1.bf16.msra.mxu0 %v936_v26  ;;  %731 = vmatpush1.bf16.msra.mxu1 %v939_v27  ;;  %v999_v3 = vld [vmem:[#allocation8 + $0x1b0] ss:$8 sps:$4 sm:$0xff]   ;;  %v1007_v5 = vld [vmem:[#allocation8 + $0x1a4] ss:$8 sps:$4 sm:$0xff]   ;;  %v1005_v7 = vld [vmem:[#allocation8 + $0x1a0] ss:$8 sps:$4 sm:$0xff]  }
  0x4e   :  { %689 = vmatprep.subr.bf16.mxu0 %v944_v28  ;;  %732 = vmatprep.subr.bf16.mxu1 %v947_v29  ;;  %v1010_v8 = vld [vmem:[#allocation8 + $0x94] ss:$8 sps:$4 sm:$0xff]   ;;  %v1008_v10 = vld [vmem:[#allocation8 + $0x90] ss:$8 sps:$4 sm:$0xff]   ;;  %v1016_v12 = vld [vmem:[#allocation8 + $0x84] ss:$8 sps:$4 sm:$0xff]  }
  0x4f   :  { %v1013_v9 = vld [vmem:[#allocation8 + $0x194] ss:$8 sps:$4 sm:$0xff]   ;;  %v1011_v11 = vld [vmem:[#allocation8 + $0x190] ss:$8 sps:$4 sm:$0xff]   ;;  %v1019_v13 = vld [vmem:[#allocation8 + $0x184] ss:$8 sps:$4 sm:$0xff]  }
  0x50   :  { %v1014_v14 = vld [vmem:[#allocation8 + $0x80] ss:$8 sps:$4 sm:$0xff]   ;;  %v92_v17 = vshrl.u32 %v91_v16, 7  ;;  %v89_v22 = vld [vmem:[#allocation7] sm:$0xf] }
  0x51   :  { %690 = vmatpush1.bf16.msra.mxu0 %v942_v30  ;;  %733 = vmatpush1.bf16.msra.mxu1 %v945_v31  ;;  %v1017_v15 = vld [vmem:[#allocation8 + $0x180] ss:$8 sps:$4 sm:$0xff]  }
  0x52   :  { %691 = vmatprep.subr.bf16.mxu0 %v950_v32  ;;  %734 = vmatprep.subr.bf16.mxu1 %v953_v33  ;;  %v97_v18 = vsub.s32 1, %v92_v17  ;;  %v105_v19 = vsub.s32 3, %v92_v17  ;;  %v93_v20 = vsub.s32 0, %v92_v17  ;;  %v101_v21 = vsub.s32 2, %v92_v17 }
  0x54   :  { %v98_v25 = vrot.slane %v89_v22, %v97_v18  ;;  %v106_v26 = vrot.slane %v89_v22, %v105_v19  ;;  %v94_v27 = vrot.slane %v89_v22, %v93_v20  ;;  %v102_v28 = vrot.slane %v89_v22, %v101_v21 }
  0x55   :  { %692 = vmatpush1.bf16.msra.mxu0 %v948_v34  ;;  %735 = vmatpush1.bf16.msra.mxu1 %v951_v35 }
  0x56   :  { %693 = vmatprep.subr.bf16.mxu0 %v956_v36  ;;  %736 = vmatprep.subr.bf16.mxu1 %v959_v37 }
  0x59   :  { %694 = vmatpush1.bf16.msra.mxu0 %v954_v38  ;;  %737 = vmatpush1.bf16.msra.mxu1 %v957_v39 }
  0x5a   :  { %695 = vmatprep.subr.bf16.mxu0 %v962_v40  ;;  %738 = vmatprep.subr.bf16.mxu1 %v965_v41 }
  0x5d   :  { %696 = vmatpush1.bf16.msra.mxu0 %v960_v42  ;;  %739 = vmatpush1.bf16.msra.mxu1 %v963_v43 }
  0x5e   :  { %697 = vmatprep.subr.bf16.mxu0 %v968_v44  ;;  %740 = vmatprep.subr.bf16.mxu1 %v971_v45 }
  0x61   :  { %698 = vmatpush1.bf16.msra.mxu0 %v966_v46  ;;  %741 = vmatpush1.bf16.msra.mxu1 %v969_v47 }
  0x62   :  { %699 = vmatprep.subr.bf16.mxu0 %v974_v48  ;;  %742 = vmatprep.subr.bf16.mxu1 %v977_v49 }
  0x65   :  { %700 = vmatpush2.bf16.msra.mxu0 %v972_v50  ;;  %743 = vmatpush2.bf16.msra.mxu1 %v975_v51 }
  0x66   :  { %701 = vmatprep.subr.bf16.mxu0 %v980_v52  ;;  %744 = vmatprep.subr.bf16.mxu1 %v983_v53 }
  0x69   :  { %702 = vmatpush2.bf16.msra.mxu0 %v978_v54  ;;  %745 = vmatpush2.bf16.msra.mxu1 %v981_v55  ;;  %v351_v55 = vld [vmem:[%s1214_s4] sm:$0x3]  ;;  %s1155_s4 = smov [#allocation10]  }
  0x6a   :  { %703 = vmatprep.subr.bf16.mxu0 %v986_v56  ;;  %746 = vmatprep.subr.bf16.mxu1 %v989_v57  ;;  %v356_v56 = vrot.slane %v351_v55, %v93_v20  ;;  %v360_v57 = vrot.slane %v351_v55, %v97_v18  ;;  %s798_s17 = sshll.u32 %s1155_s4, 4  ;;  %s799_s17 = int_to_ptr.vmem [resolvable:$true] %s798_s17 }
  0x6b   :  { %s1116_s18 = scalar_lea.vmem %s799_s17, 512  ;;  %p1121_p7 = scmp.lt.s32.totalorder %s799_s17, %s799_s17 }
  0x6c   :  { %p1117_p6 = scmp.ne.s32.totalorder %s799_s17, %s1116_s18  ;;  %p1122_p8 = scmp.lt.s32.totalorder %s1116_s18, %s1116_s18 }
  0x6d   :  { %704 = vmatpush2.bf16.msra.mxu0 %v984_v58  ;;  %747 = vmatpush2.bf16.msra.mxu1 %v987_v59 }
  0x6e   :  { %705 = vmatprep.subr.bf16.mxu0 %v992_v60  ;;  %748 = vmatprep.subr.bf16.mxu1 %v995_v61  ;;  %p1123_p9 = por %p1122_p8, %p1121_p7 }
  0x70   :  { %p1124_p10 = pnand %p1123_p9, %p1117_p6 }
  0x71   :  { %706 = vmatpush2.bf16.msra.mxu0 %v990_v62  ;;  %749 = vmatpush2.bf16.msra.mxu1 %v993_v63 }
  0x72   :  { %707 = vmatprep.subr.bf16.mxu0 %v998_v0  ;;  %750 = vmatprep.subr.bf16.mxu1 %v1001_v1 }
  0x75   :  { %708 = vmatpush2.bf16.msra.mxu0 %v996_v2  ;;  %751 = vmatpush2.bf16.msra.mxu1 %v999_v3 }
  0x76   :  { %709 = vmatprep.subr.bf16.mxu0 %v1004_v4  ;;  %752 = vmatprep.subr.bf16.mxu1 %v1007_v5 }
  0x79   :  { %710 = vmatpush2.bf16.msra.mxu0 %v1002_v6  ;;  %753 = vmatpush2.bf16.msra.mxu1 %v1005_v7 }
  0x7a   :  { %711 = vmatprep.subr.bf16.mxu0 %v1010_v8  ;;  %754 = vmatprep.subr.bf16.mxu1 %v1013_v9 }
  0x7d   :  { %712 = vmatpush2.bf16.msra.mxu0 %v1008_v10  ;;  %755 = vmatpush2.bf16.msra.mxu1 %v1011_v11 }
  0x7e   :  { %713 = vmatprep.subr.bf16.mxu0 %v1016_v12  ;;  %756 = vmatprep.subr.bf16.mxu1 %v1019_v13 }
  0x81   :  { %714 = vmatpush2.bf16.msra.mxu0 %v1014_v14  ;;  %757 = vmatpush2.bf16.msra.mxu1 %v1017_v15 }
 0x104   :  { %v223_v23 = vpop.f32.mrf.mxu0  ;;  %v266_v24 = vpop.f32.mrf.mxu1 }
 0x105   :  { %v224_v37 = vadd.f32 %v223_v23, %v94_v27  ;;  %v267_v38 = vadd.f32 %v266_v24, %v102_v28 }
 0x106   :  { %v225_v29 = vpop.f32.mrf.mxu0  ;;  %v268_v30 = vpop.f32.mrf.mxu1 }
 0x107   :  { %v226_v33 = vadd.f32 %v225_v29, %v98_v25  ;;  %v269_v34 = vadd.f32 %v268_v30, %v106_v26  ;;  %v275_v49 = vmax.f32 %v224_v37, 0.0  ;;  %v277_v50 = vmax.f32 %v267_v38, 0.0 }
 0x108   :  { %v227_v31 = vpop.f32.mrf.mxu0  ;;  %v270_v32 = vpop.f32.mrf.mxu1 }
 0x109   :  { %v228_v35 = vadd.f32 %v227_v31, %v94_v27  ;;  %v271_v36 = vadd.f32 %v270_v32, %v102_v28  ;;  %v276_v45 = vmax.f32 %v226_v33, 0.0  ;;  %v278_v46 = vmax.f32 %v269_v34, 0.0 }
 0x10a   :  { %v229_v39 = vpop.f32.mrf.mxu0  ;;  %v272_v40 = vpop.f32.mrf.mxu1 }
 0x10b   :  { %v230_v41 = vadd.f32 %v229_v39, %v98_v25  ;;  %v273_v42 = vadd.f32 %v272_v40, %v106_v26  ;;  %v279_v43 = vmax.f32 %v228_v35, 0.0  ;;  %v281_v44 = vmax.f32 %v271_v36, 0.0 }
 0x10d   :  { %v280_v47 = vmax.f32 %v230_v41, 0.0  ;;  %v282_v48 = vmax.f32 %v273_v42, 0.0  ;;  %v283_v53 = vpack.c.bf16 %v279_v43, %v275_v49  ;;  %v285_v54 = vpack.c.bf16 %v281_v44, %v277_v50 }
 0x10f   :  { %v284_v51 = vpack.c.bf16 %v280_v47, %v276_v45  ;;  %v286_v52 = vpack.c.bf16 %v282_v48, %v278_v46 }
 0x111   :  { %715 = vmatprep.mubr.bf16.mxu0 %v284_v51  ;;  %758 = vmatprep.mubr.bf16.mxu1 %v286_v52 }
 0x112   :  { %716 = vmatmul.mubr.bf16.vlgmr.msra.gmra.mxu0 %v283_v53  ;;  %759 = vmatmul.mubr.bf16.vlgmr.msra.gmra.mxu1 %v285_v54 }
 0x1d2   :  { %v717_v58 = vpop.f32.mrf.mxu0  ;;  %v760_v59 = vpop.f32.mrf.mxu1 }
 0x1d3   :  { %v718_v60 = vadd.f32 %v717_v58, %v356_v56 }
 0x1d4   :  { %v719_v61 = vpop.f32.mrf.mxu0  ;;  %v762_v62 = vpop.f32.mrf.mxu1 }
 0x1d5   :  { %v761_v63 = vadd.f32 %v760_v59, %v718_v60  ;;  %v720_v0 = vadd.f32 %v719_v61, %v360_v57 }
 0x1d6   :  { %v721_v1 = vpop.f32.mrf.mxu0  ;;  %v764_v2 = vpop.f32.mrf.mxu1 }
 0x1d7   :  { %v769_v3 = vsub.f32 0.0, %v761_v63  ;;  %v763_v4 = vadd.f32 %v762_v62, %v720_v0  ;;  %v722_v5 = vadd.f32 %v721_v1, %v356_v56 }
 0x1d8   :  { %v723_v6 = vpop.f32.mrf.mxu0  ;;  %v766_v11 = vpop.f32.mrf.mxu1 }
 0x1d9   :  { %v773_v7 = vmul.f32 1.442695, %v769_v3  ;;  %v770_v8 = vsub.f32 0.0, %v763_v4  ;;  %v765_v9 = vadd.f32 %v764_v2, %v722_v5  ;;  %v724_v10 = vadd.f32 %v723_v6, %v360_v57 }
 0x1db   :  { %1020 = vpow2.f32 %v773_v7  ;;  %v775_v12 = vmul.f32 1.442695, %v770_v8  ;;  %v771_v13 = vsub.f32 0.0, %v765_v9  ;;  %v767_v14 = vadd.f32 %v766_v11, %v724_v10 }
 0x1dd   :  { %1022 = vpow2.f32 %v775_v12  ;;  %v777_v15 = vmul.f32 1.442695, %v771_v13  ;;  %v772_v16 = vsub.f32 0.0, %v767_v14 }
 0x1df   :  { %1024 = vpow2.f32 %v777_v15  ;;  %v779_v17 = vmul.f32 1.442695, %v772_v16 }
 0x1e1   :  { %1026 = vpow2.f32 %v779_v17 }
 0x1e8   :  { %v1021_v18 = vpop.eup %1020 }
 0x1e9   :  { %v781_v19 = vadd.f32 1.0, %v1021_v18 }
 0x1ea   :  { %v1023_v20 = vpop.eup %1022 }
 0x1eb   :  { %1028 = vrcp.f32 %v781_v19  ;;  %v782_v21 = vadd.f32 1.0, %v1023_v20 }
 0x1ec   :  { %v1025_v22 = vpop.eup %1024 }
 0x1ed   :  { %1030 = vrcp.f32 %v782_v21  ;;  %v783_v23 = vadd.f32 1.0, %v1025_v22 }
 0x1ee   :  { %v1027_v24 = vpop.eup %1026 }
 0x1ef   :  { %1032 = vrcp.f32 %v783_v23  ;;  %v784_v25 = vadd.f32 1.0, %v1027_v24 }
 0x1f1   :  { %1034 = vrcp.f32 %v784_v25 }
 0x1f8   :  { %v1029_v26 = vpop.eup %1028 }
 0x1f9   :  { %789 = vst [vmem:[#allocation10] sm:$0xff] %v1029_v26 }
 0x1fa   :  { %v1031_v27 = vpop.eup %1030 }
 0x1fb   :  { %790 = vst [vmem:[#allocation10 + $0x8] sm:$0xff] %v1031_v27 }
 0x1fc   :  { %v1033_v28 = vpop.eup %1032 }
 0x1fd   :  { %791 = vst [vmem:[#allocation10 + $0x10] sm:$0xff] %v1033_v28 }
 0x1fe   :  { %v1035_v29 = vpop.eup %1034 }
 0x1ff   :  { %792 = vst [vmem:[#allocation10 + $0x18] sm:$0xff] %v1035_v29 }
 0x200   :  { %1127 = shalt.err (!%p1124_p10)
}
 0x201   :  { %804 = dma.vmem_to_hbm [thread:$0]  %s799_s17, 512, %s1215_s5, [#allocation4], %s1145_s21, %s1145_s21, %s1146_s22  }
 0x202   :  { %1142 = dma.done.wait [#allocation4], 512  }
 0x203   :  { %1143 = vsyncadd [#allocation4], 4294966784 }
 0x204   :  { %808 = vsyncpa [#allocation3], 1 }
 0x205   :  { %809 = vsyncpa [#allocation6], 1 }
 0x206   :  { %810 = vsyncpa [#allocation9], 1 }
 0x207   :  { %811 = vsyncpa [#allocation4], 1 }

</bundles_post_ra>
